<compile_context>
chip_gen: v7x
topology: tpu7x:2x2x1
jax: 0.10.0
libtpu: 0.0.40
codegen_flags: <defaults>
</compile_context>

<pallas_src>
from math import sqrt

import jax
import jax.numpy as jnp
from jax.experimental import pallas as pl
from jax.experimental.pallas import tpu as pltpu


def _round_up(x, m):
    return ((x + m - 1) // m) * m


def _cdiv(a, b):
    return (a + b - 1) // b


def _choose_tiles(dim, cap, align, min_tiles=1):
    """Split `dim` into tiles: pick the tile count first, then the (aligned) tile
    size, so padding stays < one `align` unit per tile instead of ballooning."""
    n_tiles = max(min_tiles, _cdiv(dim, cap))
    tile = _round_up(_cdiv(dim, n_tiles), align)
    return n_tiles, tile, n_tiles * tile


# --------------------------------------------------------------------------
# Kernels
# --------------------------------------------------------------------------
def _linear_kernel_single_k(x_ref, w_ref, b_ref, o_ref):
    """Whole K dim in one tile: straight dot + bias, no scratch, no pl.when."""
    acc = jnp.dot(x_ref[...], w_ref[...], preferred_element_type=jnp.float32)
    o_ref[...] = (acc + b_ref[...]).astype(o_ref.dtype)


def _linear_kernel_reduce_k(x_ref, w_ref, b_ref, o_ref, acc_ref):
    """K split across the last grid axis; f32 accumulator, bias folded into init."""
    kk = pl.program_id(2)

    @pl.when(kk == 0)
    def _():
        acc_ref[...] = jnp.broadcast_to(b_ref[...].astype(jnp.float32), acc_ref.shape)

    acc_ref[...] += jnp.dot(x_ref[...], w_ref[...],
                            preferred_element_type=jnp.float32)

    @pl.when(kk == pl.num_programs(2) - 1)
    def _():
        o_ref[...] = acc_ref[...].astype(o_ref.dtype)


# --------------------------------------------------------------------------
# Wrapper: y = x2d @ w_t + b  with w_t / b already transposed, padded, cast at init
# --------------------------------------------------------------------------
def pallas_linear(x2d, w_t, b_row, *, n_out, compute_dtype=jnp.bfloat16,
                  tm_cap=256, tn_cap=1024, tk_cap=2048,
                  single_k_vmem_budget=24 * 1024 * 1024):
    """x2d: (M, K) activations; w_t: (Kp, Np) pre-transposed/padded weight (bf16);
    b_row: (1, Np) f32 bias row; n_out: true output width.  Returns (M, n_out)."""
    m, k = x2d.shape
    kp0, np0 = w_t.shape
    assert kp0 >= k and np0 >= n_out and b_row.shape == (1, np0)

    out_dtype = x2d.dtype
    xb = jnp.dtype(compute_dtype).itemsize
    ob = jnp.dtype(out_dtype).itemsize
    align_m = 16 if xb < 4 else 8

    # N: prefer a single lane-dense tile so x streams from HBM exactly once.
    n_n, tn, np_ = _choose_tiles(np0, tn_cap, 128)
    # M: split into >=2 tiles when possible so both v7x TensorCores get work.
    min_m_tiles = 2 if m >= 2 * align_m else 1
    n_m, tm, mp = _choose_tiles(m, tm_cap, align_m, min_tiles=min_m_tiles)

    # K: keep the whole padded K dim as one tile if the double-buffered working
    # set fits the budget (no reduction axis, no accumulator, W resident).
    single_k_bytes = (2 * tm * kp0 * xb       # x tiles (double-buffered)
                      + 2 * kp0 * tn * xb     # w tiles
                      + 2 * tm * tn * ob      # out tiles
                      + 2 * tn * 4)           # bias
    single_k = single_k_bytes <= single_k_vmem_budget
    if single_k:
        n_k, tk, kp_ = 1, kp0, kp0
    else:
        n_k, tk, kp_ = _choose_tiles(kp0, tk_cap, 128)

    # --- pad inputs (no-ops for typical, already-aligned shapes) -------------
    x_c = x2d.astype(compute_dtype)
    if (mp, kp_) != (m, k):
        x_c = jnp.pad(x_c, ((0, mp - m), (0, kp_ - k)))
    if (kp_, np_) != (kp0, np0):           # rare: only when tiling exceeds 128-align pad
        w_t = jnp.pad(w_t, ((0, kp_ - kp0), (0, np_ - np0)))
        b_row = jnp.pad(b_row, ((0, 0), (0, np_ - np0)))

    cparams = pltpu.CompilerParams(
        dimension_semantics=(("parallel", "parallel") if single_k
                             else ("parallel", "parallel", "arbitrary")),
        vmem_limit_bytes=32 * 1024 * 1024,
    )

    if single_k:
        out = pl.pallas_call(
            _linear_kernel_single_k,
            out_shape=jax.ShapeDtypeStruct((mp, np_), out_dtype),
            grid_spec=pltpu.PrefetchScalarGridSpec(
                num_scalar_prefetch=0,
                grid=(n_m, n_n),
                in_specs=[
                    pl.BlockSpec((tm, kp_), lambda i, j: (i, 0)),   # x
                    pl.BlockSpec((kp_, tn), lambda i, j: (0, j)),   # W (const over i)
                    pl.BlockSpec((1, tn), lambda i, j: (0, j)),     # bias
                ],
                out_specs=pl.BlockSpec((tm, tn), lambda i, j: (i, j)),
            ),
            compiler_params=cparams,
        )(x_c, w_t, b_row)
    else:
        out = pl.pallas_call(
            _linear_kernel_reduce_k,
            out_shape=jax.ShapeDtypeStruct((mp, np_), out_dtype),
            grid_spec=pltpu.PrefetchScalarGridSpec(
                num_scalar_prefetch=0,
                grid=(n_m, n_n, n_k),
                in_specs=[
                    pl.BlockSpec((tm, tk), lambda i, j, kk: (i, kk)),   # x
                    pl.BlockSpec((tk, tn), lambda i, j, kk: (kk, j)),   # W
                    pl.BlockSpec((1, tn), lambda i, j, kk: (0, j)),     # bias
                ],
                out_specs=pl.BlockSpec((tm, tn), lambda i, j, kk: (i, j)),
                scratch_shapes=[pltpu.VMEM((tm, tn), jnp.float32)],
            ),
            compiler_params=cparams,
        )(x_c, w_t, b_row)

    if (mp, np_) == (m, n_out):
        return out
    return out[:m, :n_out]


# --------------------------------------------------------------------------
# Parameter init (mimics nn.Linear uniform(-1/sqrt(fan_in), 1/sqrt(fan_in)))
# Transpose / pad / cast of W done ONCE here, not per forward call.
# --------------------------------------------------------------------------
def init_flatten_head_params(key, nf, target_window, dtype=jnp.float32,
                             compute_dtype=jnp.bfloat16):
    kw, kb = jax.random.split(key)
    bound = 1.0 / sqrt(nf)
    w = jax.random.uniform(kw, (target_window, nf), dtype, -bound, bound)
    b = jax.random.uniform(kb, (target_window,), dtype, -bound, bound)

    kp = _round_up(nf, 128)
    np_ = _round_up(target_window, 128)
    w_t = jnp.zeros((kp, np_), compute_dtype)
    w_t = w_t.at[:nf, :target_window].set(w.T.astype(compute_dtype))
    b_row = jnp.zeros((1, np_), jnp.float32)
    b_row = b_row.at[0, :target_window].set(b.astype(jnp.float32))

    return {"w": w, "b": b, "w_t": w_t, "b_row": b_row,
            "nf": nf, "target_window": target_window}


# --------------------------------------------------------------------------
# Forward pass (flatten + Pallas GEMM; dropout = identity in eval mode)
# --------------------------------------------------------------------------
def flatten_head_forward(params, x, compute_dtype=jnp.bfloat16):
    """x: (B, n_vars, d_model, patch_num) -> (B, n_vars, target_window)."""
    B, V, D, P = x.shape
    nf = D * P
    assert nf == params["nf"]
    tw = params["target_window"]

    x_flat = x.reshape(B * V, nf)              # nn.Flatten(start_dim=-2), row-major
    y = pallas_linear(x_flat, params["w_t"], params["b_row"],
                      n_out=tw, compute_dtype=compute_dtype)
    # dropout: identity (inference)
    return y.reshape(B, V, tw)


# --------------------------------------------------------------------------
# Pure-JAX reference for validation
# --------------------------------------------------------------------------
def reference_forward(params, x):
    B, V, D, P = x.shape
    x_flat = x.reshape(B, V, D * P)
    return x_flat @ params["w"].T + params["b"]


# --------------------------------------------------------------------------
if __name__ == "__main__":
    key = jax.random.PRNGKey(0)

    # Small shapes consistent with the module: (B, n_vars, d_model, patch_num)
    B, n_vars, d_model, patch_num = 2, 4, 32, 8     # nf = 256
    target_window = 96

    kp, kx = jax.random.split(key)
    params = init_flatten_head_params(kp, d_model * patch_num, target_window)
    x = jax.random.normal(kx, (B, n_vars, d_model, patch_num), jnp.float32)

    out = flatten_head_forward(params, x)
    out = jax.block_until_ready(out)

    ref = reference_forward(params, x)
    assert out.shape == (B, n_vars, target_window)
    # bf16 GEMM with f32 accumulation -> slightly looser tolerance than pure f32.
    assert jnp.allclose(out, ref, rtol=2e-2, atol=2e-2), "mismatch vs reference"

    print("KERNEL_OK")
</pallas_src>

<mosaic_0001>
module attributes {stable_mosaic.version = 11 : i64} {
  func.func @_linear_kernel_single_k(%arg0: i32, %arg1: i32, %arg2: memref<16x256xbf16, #tpu.memory_space<vmem>>, %arg3: memref<256x128xbf16, #tpu.memory_space<vmem>>, %arg4: memref<1x128xf32, #tpu.memory_space<vmem>>, %arg5: memref<16x128xf32, #tpu.memory_space<vmem>>) attributes {dimension_semantics = [#tpu.dimension_semantics<parallel>, #tpu.dimension_semantics<parallel>], iteration_bounds = array<i64: 1, 1>, scalar_prefetch = 0 : i64, scratch_operands = 0 : i64, tpu.core_type = #tpu.core_type<tc>, window_params = [{transform_indices = @transform_0, window_bounds = array<i64: 16, 256>}, {transform_indices = @transform_1, window_bounds = array<i64: 256, 128>}, {transform_indices = @transform_2, window_bounds = array<i64: 1, 128>}, {transform_indices = @transform_3, window_bounds = array<i64: 16, 128>}]} {
    %c0 = arith.constant 0 : index
    %c0_0 = arith.constant 0 : index
    %0 = vector.load %arg2[%c0, %c0_0] : memref<16x256xbf16, #tpu.memory_space<vmem>>, vector<16x256xbf16>
    %c0_1 = arith.constant 0 : index
    %c0_2 = arith.constant 0 : index
    %1 = vector.load %arg3[%c0_1, %c0_2] : memref<256x128xbf16, #tpu.memory_space<vmem>>, vector<256x128xbf16>
    %cst = arith.constant dense<0.000000e+00> : vector<16x128xf32>
    %2 = tpu.matmul %0, %1, %cst {dimension_numbers = #tpu.dot_dimension_numbers<[1], [0], [0], [1], [0, 0, 1, 1], [], []>} : vector<16x256xbf16>, vector<256x128xbf16>, vector<16x128xf32> -> vector<16x128xf32>
    %c0_3 = arith.constant 0 : index
    %c0_4 = arith.constant 0 : index
    %3 = vector.load %arg4[%c0_3, %c0_4] : memref<1x128xf32, #tpu.memory_space<vmem>>, vector<1x128xf32>
    %4 = vector.broadcast %3 : vector<1x128xf32> to vector<16x128xf32>
    %5 = arith.addf %2, %4 : vector<16x128xf32>
    %c0_5 = arith.constant 0 : index
    %c0_6 = arith.constant 0 : index
    %6 = vector.load %arg5[%c0_5, %c0_6] : memref<16x128xf32, #tpu.memory_space<vmem>>, vector<16x128xf32>
    tpu.vector_store %arg5[%c0_5, %c0_6], %5 {strides = array<i32>} : memref<16x128xf32, #tpu.memory_space<vmem>>, vector<16x128xf32>,
    return
  }
  func.func @transform_0(%arg0: i32, %arg1: i32) -> (i32, i32) {
    %c0_i32 = arith.constant 0 : i32
    %c0_i32_0 = arith.constant 0 : i32
    return %arg0, %c0_i32 : i32, i32
  }
  func.func @transform_1(%arg0: i32, %arg1: i32) -> (i32, i32) {
    %c0_i32 = arith.constant 0 : i32
    %c0_i32_0 = arith.constant 0 : i32
    return %c0_i32, %arg1 : i32, i32
  }
  func.func @transform_2(%arg0: i32, %arg1: i32) -> (i32, i32) {
    %c0_i32 = arith.constant 0 : i32
    %c0_i32_0 = arith.constant 0 : i32
    return %c0_i32, %arg1 : i32, i32
  }
  func.func @transform_3(%arg0: i32, %arg1: i32) -> (i32, i32) {
    %c0_i32 = arith.constant 0 : i32
    return %arg0, %arg1 : i32, i32
  }
}

</mosaic_0001>

<bundles_post_ra>
// kernel: tpu_custom_call.1
= control target key start
LH: loop header
LB: loop body
LE: loop exit
PB: predicated region body
PF: predicated region fallthrough
CT: control target
= control target key end

     0   :  { %8 = vsyncpa [#allocation3], 0  ;;  %s463_s0 = inlined_call_operand.hbm [shape: bf16[16,256], index: 0, kind: input, shape index: {}]   ;;  %s464_s1 = inlined_call_operand.hbm [shape: bf16[256,128], index: 1, kind: input, shape index: {}]   ;;  %s465_s2 = inlined_call_operand.vmem [shape: f32[1,128], index: 2, kind: input, shape index: {}]   ;;  %s466_s3 = inlined_call_operand.hbm [shape: f32[16,128], index: 3, kind: output, shape index: {}]  }
   0x1   :  { %9 = vsyncpa [#allocation6], 0 }
   0x2   :  { %10 = vsyncpa [#allocation4], 0  ;;  %s391_s12 = smov [#allocation2]   ;;  %s319_s16 = scalar_lea.hbm %s463_s0, 256 }
   0x3   :  { %s16_s13 = sshll.u32 %s391_s12, 4  ;;  %p320_p0 = scmp.ne.s32.totalorder %s463_s0, %s319_s16  ;;  %s17_s13 = int_to_ptr.vmem [resolvable:$true] %s16_s13 }
   0x4   :  { %p323_p1 = scmp.lt.u32.totalorder %s319_s16, %s463_s0 }
   0x6   :  { %p325_p2 = pnand %p323_p1, %p320_p0 }
   0x8   :  { %328 = shalt.err (!%p325_p2)
}
   0x9   :  { %s329_s21 = scalar_lea.vmem %s17_s13, 256  ;;  %p334_p4 = scmp.lt.s32.totalorder %s17_s13, %s17_s13 }
   0xa   :  { %p330_p3 = scmp.ne.s32.totalorder %s17_s13, %s329_s21  ;;  %p335_p5 = scmp.lt.s32.totalorder %s329_s21, %s329_s21 }
   0xc   :  { %p336_p6 = por %p335_p5, %p334_p4 }
   0xe   :  { %p337_p7 = pnand %p336_p6, %p330_p3 }
  0x10   :  { %340 = shalt.err (!%p337_p7)
}
  0x11   :  { %s392_s22 = smov 128   ;;  %s393_s23 = smov 8  }
  0x12   :  { %22 = dma.hbm_to_vmem [thread:$0]  %s463_s0, 256, %s17_s13, [#allocation3], %s392_s22, %s392_s22, %s393_s23  }
  0x13   :  { %s394_s26 = smov [#allocation5]   ;;  %s341_s30 = scalar_lea.hbm %s464_s1, 2048 }
  0x14   :  { %s28_s27 = sshll.u32 %s394_s26, 4  ;;  %p342_p8 = scmp.ne.s32.totalorder %s464_s1, %s341_s30  ;;  %s29_s27 = int_to_ptr.vmem [resolvable:$true] %s28_s27 }
  0x15   :  { %p345_p9 = scmp.lt.u32.totalorder %s341_s30, %s464_s1 }
  0x17   :  { %p347_p10 = pnand %p345_p9, %p342_p8 }
  0x19   :  { %350 = shalt.err (!%p347_p10)
}
  0x1a   :  { %s351_s8 = scalar_lea.vmem %s29_s27, 2048  ;;  %p356_p12 = scmp.lt.s32.totalorder %s29_s27, %s29_s27 }
  0x1b   :  { %p352_p11 = scmp.ne.s32.totalorder %s29_s27, %s351_s8  ;;  %p357_p13 = scmp.lt.s32.totalorder %s351_s8, %s351_s8 }
  0x1d   :  { %p358_p0 = por %p357_p13, %p356_p12 }
  0x1f   :  { %p359_p1 = pnand %p358_p0, %p352_p11 }
  0x21   :  { %362 = shalt.err (!%p359_p1)
}
  0x22   :  { %s395_s0 = smov 64   ;;  %s396_s9 = smov 4  }
  0x23   :  { %34 = dma.hbm_to_vmem [thread:$0]  %s464_s1, 2048, %s29_s27, [#allocation6], %s395_s0, %s395_s0, %s396_s9  }
  0x24   :  { %385 = dma.done.wait [#allocation3], 256  }
  0x25   :  { %386 = vsyncadd [#allocation3], 4294967040 }
  0x26   :  { %387 = dma.done.wait [#allocation6], 2048  }
  0x27   :  { %388 = vsyncadd [#allocation6], 4294965248  ;;  %v300_v0 = vld [vmem:[#allocation5 + $0x40] sm:$0xff]   ;;  %v302_v2 = vld [vmem:[#allocation5 + $0x48] sm:$0xff]   ;;  %s397_s13 = smov [#allocation7]  }
  0x28   :  { %v301_v1 = vld [vmem:[#allocation5] sm:$0xff]   ;;  %271 = vmatprep.subr.bf16.mxu0 %v300_v0  ;;  %v303_v3 = vld [vmem:[#allocation5 + $0x8] sm:$0xff]   ;;  %v304_v4 = vld [vmem:[#allocation5 + $0x50] sm:$0xff]   ;;  %s239_s14 = sshll.u32 %s397_s13, 4  ;;  %s240_s14 = int_to_ptr.vmem [resolvable:$true] %s239_s14 }
  0x29   :  { %272 = vmatpush3.bf16.msra.mxu0 %v301_v1  ;;  %v305_v5 = vld [vmem:[#allocation5 + $0x10] sm:$0xff]   ;;  %v306_v6 = vld [vmem:[#allocation5 + $0x58] sm:$0xff]   ;;  %v308_v8 = vld [vmem:[#allocation5 + $0x60] sm:$0xff]   ;;  %s363_s15 = scalar_lea.vmem %s240_s14, 256  ;;  %p368_p3 = scmp.lt.s32.totalorder %s240_s14, %s240_s14 }
  0x2a   :  { %273 = vmatprep.subr.bf16.mxu0 %v302_v2  ;;  %v307_v7 = vld [vmem:[#allocation5 + $0x18] sm:$0xff]   ;;  %v309_v9 = vld [vmem:[#allocation5 + $0x20] sm:$0xff]   ;;  %v310_v10 = vld [vmem:[#allocation5 + $0x68] sm:$0xff]   ;;  %p364_p2 = scmp.ne.s32.totalorder %s240_s14, %s363_s15  ;;  %p369_p4 = scmp.lt.s32.totalorder %s363_s15, %s363_s15 }
  0x2b   :  { %v318_v11 = vld [vmem:[#allocation2 + $0x4] ss:$8 sps:$4 sm:$0xff]   ;;  %v311_v12 = vld [vmem:[#allocation5 + $0x28] sm:$0xff]   ;;  %v316_v17 = vld [vmem:[#allocation2] ss:$8 sps:$4 sm:$0xff]  }
  0x2c   :  { %223 = vmatprep.mubr.bf16.mxu0 %v318_v11  ;;  %v312_v13 = vld [vmem:[#allocation5 + $0x70] sm:$0xff]   ;;  %v314_v15 = vld [vmem:[#allocation5 + $0x78] sm:$0xff]   ;;  %p370_p5 = por %p369_p4, %p368_p3 }
  0x2d   :  { %274 = vmatpush3.bf16.msra.mxu0 %v303_v3  ;;  %v313_v14 = vld [vmem:[#allocation5 + $0x30] sm:$0xff]   ;;  %v315_v16 = vld [vmem:[#allocation5 + $0x38] sm:$0xff]  }
  0x2e   :  { %275 = vmatprep.subr.bf16.mxu0 %v304_v4  ;;  %v252_v19 = vld [vmem:[%s465_s2] ss:$0 sm:$0xff]  ;;  %p371_p6 = pnand %p370_p5, %p364_p2 }
  0x31   :  { %276 = vmatpush3.bf16.msra.mxu0 %v305_v5 }
  0x32   :  { %277 = vmatprep.subr.bf16.mxu0 %v306_v6 }
  0x35   :  { %278 = vmatpush3.bf16.msra.mxu0 %v307_v7 }
  0x36   :  { %279 = vmatprep.subr.bf16.mxu0 %v308_v8 }
  0x39   :  { %280 = vmatpush3.bf16.msra.mxu0 %v309_v9 }
  0x3a   :  { %281 = vmatprep.subr.bf16.mxu0 %v310_v10 }
  0x3d   :  { %282 = vmatpush3.bf16.msra.mxu0 %v311_v12 }
  0x3e   :  { %283 = vmatprep.subr.bf16.mxu0 %v312_v13 }
  0x41   :  { %284 = vmatpush3.bf16.msra.mxu0 %v313_v14 }
  0x42   :  { %285 = vmatprep.subr.bf16.mxu0 %v314_v15 }
  0x45   :  { %286 = vmatpush3.bf16.msra.mxu0 %v315_v16 }
  0x48   :  { %224 = vmatmul.mubr.bf16.vlgmr.msra.gmra.mrb[0].mxu0 %v316_v17 }
 0x11b   :  { %v287_v18 = vpop.f32.mrb[0].mxu0 }
 0x11c   :  { %v288_v20 = vpop.f32.mrb[1].mxu0 }
 0x11d   :  { %v289_v21 = vadd.f32 %v288_v20, %v287_v18  ;;  %v290_v22 = vpop.f32.mrb[2].mxu0 }
 0x11e   :  { %v291_v23 = vpop.f32.mrb[3].mxu0 }
 0x11f   :  { %v226_v24 = vadd.f32 %v289_v21, %v252_v19  ;;  %v292_v25 = vadd.f32 %v291_v23, %v290_v22 }
 0x121   :  { %232 = vst [vmem:[#allocation7] sm:$0xff] %v226_v24  ;;  %v229_v26 = vadd.f32 %v292_v25, %v252_v19 }
 0x123   :  { %233 = vst [vmem:[#allocation7 + $0x8] sm:$0xff] %v229_v26 }
 0x124   :  { %374 = shalt.err (!%p371_p6)
}
 0x125   :  { %s375_s17 = scalar_lea.hbm %s466_s3, 256 }
 0x126   :  { %p376_p7 = scmp.ne.s32.totalorder %s466_s3, %s375_s17  ;;  %p379_p8 = scmp.lt.u32.totalorder %s375_s17, %s466_s3 }
 0x128   :  { %p381_p9 = pnand %p379_p8, %p376_p7 }
 0x12a   :  { %384 = shalt.err (!%p381_p9)
}
 0x12b   :  { %245 = dma.vmem_to_hbm [thread:$0]  %s240_s14, 256, %s466_s3, [#allocation4], %s392_s22, %s392_s22, %s393_s23  }
 0x12c   :  { %389 = dma.done.wait [#allocation4], 256  }
 0x12d   :  { %390 = vsyncadd [#allocation4], 4294967040 }
 0x12e   :  { %249 = vsyncpa [#allocation3], 1 }
 0x12f   :  { %250 = vsyncpa [#allocation6], 1 }
 0x130   :  { %251 = vsyncpa [#allocation4], 1 }

</bundles_post_ra>
